<compile_context>
chip_gen: v7x
topology: tpu7x:2x2x1
jax: 0.10.0
libtpu: 0.0.40
codegen_flags: <defaults>
</compile_context>

<pallas_src>
import jax
import jax.numpy as jnp
from jax.experimental import pallas as pl
from jax.experimental.pallas import tpu as pltpu

IN_FEATURES = 8
OUT_FEATURES = 3
LANE = 128

# Below this batch size the Pallas custom call is strictly worse than letting
# XLA fuse the tiny 8->3 dot with its neighbors.
SMALL_BATCH_FALLBACK = 4096
# If the padded batch is at least this big, force >=2 grid steps so both
# TensorCores get work on v7x.
MIN_BATCH_FOR_SPLIT = 32768


def _linear_kernel(x_ref, w_ref, b_ref, o_ref):
    # x_ref: (IN, TB)   batch on lanes (lane-dense loads)
    # w_ref: (OUT, IN)  torch weight layout, resident across grid steps
    # b_ref: (OUT, 1)   bias column, resident across grid steps
    # o_ref: (OUT, TB)  batch on lanes (lane-dense stores)
    acc = jnp.dot(w_ref[...], x_ref[...], preferred_element_type=jnp.float32)
    o_ref[...] = (acc + b_ref[...]).astype(o_ref.dtype)


def _round_up(v, m):
    return ((v + m - 1) // m) * m


def classifier_forward(x, w, b, *, max_tile=65536, use_pallas=None):
    """Forward of nn.Linear(8, 3): returns x @ w.T + b.

    x: (B, 8) float32
    w: (3, 8) float32  (torch nn.Linear weight layout)
    b: (3,)   float32
    use_pallas: None -> auto (fallback to plain JAX for small B);
                True/False forces the path.
    """
    B = x.shape[0]

    if use_pallas is None:
        use_pallas = B >= SMALL_BATCH_FALLBACK
    if not use_pallas:
        # Small-batch path: let XLA fuse the tiny dot with producer/consumer.
        return x @ w.T + b

    # Tile size must be a multiple of 128 lanes.
    max_tile = max(LANE, (max_tile // LANE) * LANE)

    # Pad batch only to a multiple of 128 (never to a multiple of a huge tile).
    b_padded = max(LANE, _round_up(B, LANE))

    # Balanced tiling: number of tiles from the target max tile, then derive a
    # per-tile size (multiple of 128).  Padding added here is < 128 per tile.
    num_tiles = pl.cdiv(b_padded, max_tile)
    if b_padded >= MIN_BATCH_FOR_SPLIT:
        num_tiles = max(num_tiles, 2)  # keep both v7x TensorCores busy
    tb = _round_up(pl.cdiv(b_padded, num_tiles), LANE)
    b_padded = num_tiles * tb

    # Layout plumbing (pad + transpose) outside the kernel.
    x_pad = jnp.pad(x, ((0, b_padded - B), (0, 0)))  # (Bp, IN)
    x_t = x_pad.T                                    # (IN, Bp) lane-dense
    b_col = b.reshape(OUT_FEATURES, 1)               # (OUT, 1)

    cost = pl.CostEstimate(
        flops=2 * IN_FEATURES * OUT_FEATURES * b_padded,
        transcendentals=0,
        bytes_accessed=(IN_FEATURES + OUT_FEATURES) * 4 * b_padded
        + 4 * (IN_FEATURES * OUT_FEATURES + OUT_FEATURES),
    )

    out_t = pl.pallas_call(
        _linear_kernel,
        out_shape=jax.ShapeDtypeStruct((OUT_FEATURES, b_padded), x.dtype),
        grid=(num_tiles,),
        in_specs=[
            pl.BlockSpec((IN_FEATURES, tb), lambda i: (0, i)),
            pl.BlockSpec((OUT_FEATURES, IN_FEATURES), lambda i: (0, 0)),
            pl.BlockSpec((OUT_FEATURES, 1), lambda i: (0, 0)),
        ],
        out_specs=pl.BlockSpec((OUT_FEATURES, tb), lambda i: (0, i)),
        compiler_params=pltpu.CompilerParams(
            dimension_semantics=("parallel",),
        ),
        cost_estimate=cost,
    )(x_t, w, b_col)

    # Layout plumbing back to (B, OUT), dropping batch padding.
    return out_t.T[:B, :]


if __name__ == "__main__":
    key = jax.random.PRNGKey(0)
    k_x1, k_x2, k_w, k_b = jax.random.split(key, 4)

    # Deterministic parameter init mimicking nn.Linear default:
    # U(-1/sqrt(in), 1/sqrt(in))
    bound = 1.0 / (IN_FEATURES ** 0.5)
    w = jax.random.uniform(k_w, (OUT_FEATURES, IN_FEATURES), jnp.float32, -bound, bound)
    b = jax.random.uniform(k_b, (OUT_FEATURES,), jnp.float32, -bound, bound)

    # 1) Small batch: auto path (plain JAX fallback).
    x_small = jax.random.normal(k_x1, (8, IN_FEATURES), jnp.float32)
    out_small = classifier_forward(x_small, w, b)
    jax.block_until_ready(out_small)
    ref_small = x_small @ w.T + b
    assert out_small.shape == (8, OUT_FEATURES)
    assert jnp.allclose(out_small, ref_small, atol=1e-5, rtol=1e-5)

    # 2) Force the Pallas path with a non-multiple-of-128 batch to exercise
    #    padding / tiling / un-padding.
    x_pl = jax.random.normal(k_x2, (300, IN_FEATURES), jnp.float32)
    out_pl = classifier_forward(x_pl, w, b, use_pallas=True)
    jax.block_until_ready(out_pl)
    ref_pl = x_pl @ w.T + b
    assert out_pl.shape == (300, OUT_FEATURES)
    assert jnp.allclose(out_pl, ref_pl, atol=1e-5, rtol=1e-5)

    print("KERNEL_OK")
</pallas_src>

<mosaic_0001>
module attributes {stable_mosaic.version = 11 : i64} {
  func.func @_linear_kernel(%arg0: i32, %arg1: memref<8x384xf32, #tpu.memory_space<vmem>>, %arg2: memref<3x8xf32, #tpu.memory_space<vmem>>, %arg3: memref<3x1xf32, #tpu.memory_space<vmem>>, %arg4: memref<3x384xf32, #tpu.memory_space<vmem>>) attributes {dimension_semantics = [#tpu.dimension_semantics<parallel>], iteration_bounds = array<i64: 1>, scalar_prefetch = 0 : i64, scratch_operands = 0 : i64, tpu.core_type = #tpu.core_type<tc>, window_params = [{transform_indices = @transform_0, window_bounds = array<i64: 8, 384>}, {pipeline_mode = #tpu.pipeline_mode<synchronous>, transform_indices = @transform_1, window_bounds = array<i64: 3, 8>}, {pipeline_mode = #tpu.pipeline_mode<synchronous>, transform_indices = @transform_2, window_bounds = array<i64: 3, 1>}, {transform_indices = @transform_3, window_bounds = array<i64: 3, 384>}]} {
    %c0 = arith.constant 0 : index
    %c0_0 = arith.constant 0 : index
    %0 = vector.load %arg2[%c0, %c0_0] : memref<3x8xf32, #tpu.memory_space<vmem>>, vector<3x8xf32>
    %c0_1 = arith.constant 0 : index
    %c0_2 = arith.constant 0 : index
    %1 = vector.load %arg1[%c0_1, %c0_2] : memref<8x384xf32, #tpu.memory_space<vmem>>, vector<8x384xf32>
    %cst = arith.constant dense<0.000000e+00> : vector<3x384xf32>
    %2 = tpu.matmul %0, %1, %cst {dimension_numbers = #tpu.dot_dimension_numbers<[1], [0], [0], [1], [0, 0, 1, 1], [], []>} : vector<3x8xf32>, vector<8x384xf32>, vector<3x384xf32> -> vector<3x384xf32>
    %c0_3 = arith.constant 0 : index
    %c0_4 = arith.constant 0 : index
    %3 = vector.load %arg3[%c0_3, %c0_4] : memref<3x1xf32, #tpu.memory_space<vmem>>, vector<3x1xf32>
    %4 = vector.broadcast %3 : vector<3x1xf32> to vector<3x384xf32>
    %5 = arith.addf %2, %4 : vector<3x384xf32>
    %c0_5 = arith.constant 0 : index
    %c0_6 = arith.constant 0 : index
    %6 = vector.load %arg4[%c0_5, %c0_6] : memref<3x384xf32, #tpu.memory_space<vmem>>, vector<3x384xf32>
    tpu.vector_store %arg4[%c0_5, %c0_6], %5 {strides = array<i32>} : memref<3x384xf32, #tpu.memory_space<vmem>>, vector<3x384xf32>,
    return
  }
  func.func @transform_0(%arg0: i32) -> (i32, i32) {
    %c0_i32 = arith.constant 0 : i32
    %c0_i32_0 = arith.constant 0 : i32
    return %c0_i32, %arg0 : i32, i32
  }
  func.func @transform_1(%arg0: i32) -> (i32, i32) {
    %c0_i32 = arith.constant 0 : i32
    %c0_i32_0 = arith.constant 0 : i32
    %c0_i32_1 = arith.constant 0 : i32
    return %c0_i32, %c0_i32_0 : i32, i32
  }
  func.func @transform_2(%arg0: i32) -> (i32, i32) {
    %c0_i32 = arith.constant 0 : i32
    %c0_i32_0 = arith.constant 0 : i32
    %c0_i32_1 = arith.constant 0 : i32
    return %c0_i32, %c0_i32_0 : i32, i32
  }
  func.func @transform_3(%arg0: i32) -> (i32, i32) {
    %c0_i32 = arith.constant 0 : i32
    %c0_i32_0 = arith.constant 0 : i32
    return %c0_i32, %arg0 : i32, i32
  }
}

</mosaic_0001>

<bundles_post_ra>
// kernel: tpu_custom_call.1
= control target key start
LH: loop header
LB: loop body
LE: loop exit
PB: predicated region body
PF: predicated region fallthrough
CT: control target
= control target key end

     0   :  { %8 = vsyncpa [#allocation3], 0  ;;  %s321_s0 = inlined_call_operand.hbm [shape: f32[8,384], index: 0, kind: input, shape index: {}]   ;;  %s322_s1 = inlined_call_operand.vmem [shape: f32[3,8], index: 1, kind: input, shape index: {}]   ;;  %s323_s2 = inlined_call_operand.vmem [shape: f32[3,1], index: 2, kind: input, shape index: {}]   ;;  %s324_s3 = inlined_call_operand.hbm [shape: f32[3,384], index: 3, kind: output, shape index: {}]  }
   0x1   :  { %9 = vsyncpa [#allocation4], 0  ;;  %s266_s12 = smov [#allocation2]   ;;  %s218_s16 = scalar_lea.hbm %s321_s0, 384 }
   0x2   :  { %s16_s13 = sshll.u32 %s266_s12, 4  ;;  %p219_p0 = scmp.ne.s32.totalorder %s321_s0, %s218_s16  ;;  %s17_s13 = int_to_ptr.vmem [resolvable:$true] %s16_s13 }
   0x3   :  { %p222_p1 = scmp.lt.u32.totalorder %s218_s16, %s321_s0 }
   0x5   :  { %p224_p2 = pnand %p222_p1, %p219_p0 }
   0x7   :  { %227 = shalt.err (!%p224_p2)
}
   0x8   :  { %s228_s21 = scalar_lea.vmem %s17_s13, 384  ;;  %p233_p4 = scmp.lt.s32.totalorder %s17_s13, %s17_s13 }
   0x9   :  { %p229_p3 = scmp.ne.s32.totalorder %s17_s13, %s228_s21  ;;  %p234_p5 = scmp.lt.s32.totalorder %s228_s21, %s228_s21 }
   0xb   :  { %p235_p6 = por %p234_p5, %p233_p4 }
   0xd   :  { %p236_p7 = pnand %p235_p6, %p229_p3 }
   0xf   :  { %239 = shalt.err (!%p236_p7)
}
  0x10   :  { %19 = dma.hbm_to_vmem [thread:$0]  %s321_s0, 384, %s17_s13, [#allocation3]  }
  0x11   :  { %262 = dma.done.wait [#allocation3], 384  }
  0x12   :  { %263 = vsyncadd [#allocation3], 4294966912  ;;  %v267_v0 = vmov 0.0   ;;  %vm268_vm0 = vmmov 0   ;;  %v269_v1 = vmov 0   ;;  %v29_v2 = vld [vmem:[#allocation2 + $0x8] sm:$0xff] }
  0x13   :  { %105 = vmatprep.mubr.f32.mxu0 %v267_v0  ;;  %207 = vmatprep.subr.mxu1 %v267_v0  ;;  %v28_v3 = vld [vmem:[#allocation2] sm:$0xff]  ;;  %vm37_vm1 = vcmask 64512   ;;  %v30_v5 = vld [vmem:[#allocation2 + $0x10] sm:$0xff] }
  0x14   :  { %209 = vmatprep.mubr.msk.f32.mxu1 %vm268_vm0, %v267_v0  ;;  %217 = vset.pattern.permute.xlu0 %v269_v1  ;;  %v27_v4 = vld [vmem:[%s322_s1] sm:$0x7]  ;;  %s270_s1 = smov [#allocation5]  }
  0x15   :  { %41 = vmatprep.subr.mxu0 %v29_v2  ;;  %v31_v6 = vld [vmem:[%s323_s2] sm:$0x7]  ;;  %208 = vmatpush3.msra.mxu1 %v30_v5  ;;  %s194_s27 = sshll.u32 %s270_s1, 4  ;;  %s195_s27 = int_to_ptr.vmem [resolvable:$true] %s194_s27 }
  0x16   :  { %42 = vmatpush1.msra.mxu0 %v28_v3  ;;  %210 = vmatmul.mubr.msk.f32.vlgmr.msra.gmra.mrb[0].mxu1 %vm37_vm1, %v27_v4  ;;  %s240_s2 = scalar_lea.vmem %s195_s27, 192  ;;  %p245_p9 = scmp.lt.s32.totalorder %s195_s27, %s195_s27 }
  0x17   :  { %203 = vmatmul.mubr.msk.f32.vlgmr.msra.gmra.mrb[0].mxu0 %vm37_vm1, %v27_v4  ;;  %34 = vperm.xlu0 %217, %v31_v6   ;;  %p241_p8 = scmp.ne.s32.totalorder %s195_s27, %s240_s2  ;;  %p246_p10 = scmp.lt.s32.totalorder %s240_s2, %s240_s2 }
  0x19   :  { %p247_p11 = por %p246_p10, %p245_p9 }
  0x1b   :  { %p248_p12 = pnand %p247_p11, %p241_p8 }
  0x96   :  { %v35_v7 = vpop.permute.xlu0 %34 }
  0xe9   :  { %v178_v9 = vpop.f32.mrb[0].mxu1 }
  0xea   :  { %v107_v8 = vpop.f32.mrb[0].mxu0  ;;  %v179_v12 = vadd.f32 %v178_v9, %v35_v7  ;;  %v211_v13 = vpop.f32.mrb[1].mxu1 }
  0xeb   :  { %v108_v10 = vadd.f32 %v107_v8, %v35_v7  ;;  %v109_v11 = vpop.f32.mrb[1].mxu0 }
  0xec   :  { %v110_v14 = vadd.f32 %v109_v11, %v35_v7  ;;  %187 = vst [vmem:[#allocation5 + $0x8] sm:$0x7] %v179_v12 }
  0xee   :  { %v184_v15 = vcombine.low %v108_v10, %v110_v14 }
  0xf0   :  { %186 = vst [vmem:[#allocation5] sm:$0x77] %v184_v15 }
  0xf1   :  { %251 = shalt.err (!%p248_p12)
}
  0xf2   :  { %s252_s30 = scalar_lea.hbm %s324_s3, 192 }
  0xf3   :  { %p253_p13 = scmp.ne.s32.totalorder %s324_s3, %s252_s30  ;;  %p256_p0 = scmp.lt.u32.totalorder %s252_s30, %s324_s3 }
  0xf5   :  { %p258_p1 = pnand %p256_p0, %p253_p13 }
  0xf7   :  { %261 = shalt.err (!%p258_p1)
}
  0xf8   :  { %197 = dma.vmem_to_hbm [thread:$0]  %s195_s27, 192, %s324_s3, [#allocation4]  }
  0xf9   :  { %264 = dma.done.wait [#allocation4], 192  }
  0xfa   :  { %265 = vsyncadd [#allocation4], 4294967104 }
  0xfb   :  { %201 = vsyncpa [#allocation3], 1 }
  0xfc   :  { %202 = vsyncpa [#allocation4], 1 }

</bundles_post_ra>
